<compile_context>
chip_gen: v5e
topology: v5e:2x2
jax: 0.10.0
libtpu: 0.0.40
codegen_flags: <defaults>
</compile_context>

<pallas_src>
import jax
import jax.numpy as jnp
from jax import lax
from jax.experimental import pallas as pl
from jax.experimental.pallas import tpu as pltpu


def _round_up(x: int, m: int) -> int:
    return ((x + m - 1) // m) * m


def _sublane_pack(dtype) -> int:
    """Rows per packed sublane group in VMEM: 8 for 32-bit, 16 for 16-bit, 32 for 8-bit."""
    itemsize = jnp.dtype(dtype).itemsize
    return 8 * max(1, 4 // itemsize)


def _plan_tiles(N, C, HW, x_dtype, t_dtype, *,
                hbm_target_bytes=8 << 20,        # ~2-3 us of DMA/step on v7x
                vmem_input_budget=36 << 20,      # padded, double-buffered inputs
                max_chunk=1024):
    """Pick (t_hw, chunk, num_j): lane-tile width, in-kernel sub-chunk, #tiles."""
    x_item = jnp.dtype(x_dtype).itemsize
    t_item = jnp.dtype(t_dtype).itemsize

    # VMEM bytes per lane of tile *including* sublane padding (small C pads to a
    # full packed group; the 1-row target block pads to 8/16/32 rows).
    vmem_per_lane = (_round_up(C, _sublane_pack(x_dtype)) * x_item
                     + _sublane_pack(t_dtype) * t_item)
    # HBM bytes per lane actually transferred (padding is VMEM-only).
    hbm_per_lane = C * x_item + t_item

    t_hw = min(hbm_target_bytes // hbm_per_lane,
               vmem_input_budget // (2 * vmem_per_lane))     # 2 = double buffer
    t_hw = max(128, (t_hw // 128) * 128)

    # Megacore / pipelining: aim for >= 4 grid cells when the batch is small.
    min_tiles = min(-(-4 // N), -(-HW // 128))
    tiles = max(-(-HW // t_hw), min_tiles)
    t_hw = _round_up(-(-HW // tiles), 128)

    chunk = min(max_chunk, t_hw)
    t_hw = _round_up(t_hw, chunk)
    num_j = -(-HW // t_hw)
    return t_hw, chunk, num_j


def _make_kernel(ignore_index: int, C: int, HW: int, t_hw: int, chunk: int):
    n_chunks = t_hw // chunk
    ragged = (HW % t_hw) != 0   # only then can a block / chunk run past HW

    def occ_loss_kernel(x_ref, t_ref, out_ref):
        j = pl.program_id(1)

        # Hoisted out of the chunk loop (JAX does not CSE broadcast_in_dim).
        cls = lax.broadcasted_iota(jnp.int32, (C, chunk), 0)
        if ragged:
            lane = lax.broadcasted_iota(jnp.int32, (1, chunk), 1)
            limit = HW - j * t_hw          # scalar; >= t_hw for all non-last blocks

        def chunk_stats(k, carry):
            s_acc, c_acc = carry
            off = pl.multiple_of(k * chunk, 128)

            x = x_ref[0, :, pl.ds(off, chunk)].astype(jnp.float32)   # (C, chunk)
            t = t_ref[0, :, pl.ds(off, chunk)].astype(jnp.int32)     # (1, chunk)

            # Cross entropy per spatial position: logsumexp_c(x) - x[target]
            m = jnp.max(x, axis=0, keepdims=True)                               # (1, chunk)
            lse = jnp.log(jnp.sum(jnp.exp(x - m), axis=0, keepdims=True)) + m   # (1, chunk)
            tgt_logit = jnp.sum(jnp.where(cls == t, x, 0.0), axis=0, keepdims=True)
            ce = lse - tgt_logit                                                 # (1, chunk)

            # argmax over classes (first maximal index)
            pred = jnp.min(jnp.where(x == m, cls, C), axis=0, keepdims=True)     # (1, chunk)

            # ordinal weight |pred - target| + 1
            w = (jnp.abs(pred - t) + 1).astype(jnp.float32)

            valid = t != ignore_index
            if ragged:   # compiled in only when a tile can overrun HW
                valid = valid & (lane < (limit - off))

            s_acc = s_acc + jnp.where(valid, ce * w, 0.0)
            c_acc = c_acc + valid.astype(jnp.float32)
            return s_acc, c_acc

        zero = jnp.zeros((1, chunk), jnp.float32)
        s_acc, c_acc = lax.fori_loop(0, n_chunks, chunk_stats, (zero, zero),
                                     unroll=min(4, n_chunks))

        # Lane-dense merged partial output: row 0 = weighted-CE, row 1 = count.
        out_ref[0, 0, 0:1, :] = s_acc
        out_ref[0, 0, 1:2, :] = c_acc

    return occ_loss_kernel


def ordered_cross_entropy_loss(output, target, ignore_index: int = -100,
                               *, t_hw=None, chunk=None):
    """output: (N, C, H, W) float, target: (N, H, W) int. Returns scalar f32 loss."""
    N, C, H, W = output.shape
    HW = H * W

    # Free row-major views -- no transpose / pad / astype HBM passes.
    x = output.reshape(N, C, HW)
    t = target.reshape(N, 1, HW)            # native dtype; cast per block in-kernel

    auto_t_hw, auto_chunk, _ = _plan_tiles(N, C, HW, x.dtype, t.dtype)
    if t_hw is None:
        t_hw = auto_t_hw
    if chunk is None:
        chunk = min(auto_chunk, t_hw)
    assert chunk % 128 == 0 and t_hw % chunk == 0
    num_j = pl.cdiv(HW, t_hw)

    # TODO(synk): for extremely large C (padded C block exceeding the VMEM budget
    # at t_hw=128) add a grid axis over C with an online (flash-style) max/sum.

    kernel = _make_kernel(ignore_index, C, HW, t_hw, chunk)

    x_item = jnp.dtype(x.dtype).itemsize
    t_item = jnp.dtype(t.dtype).itemsize
    cost = pl.CostEstimate(
        flops=10 * N * C * HW,
        transcendentals=N * (C + 1) * HW,
        bytes_accessed=N * C * HW * x_item + N * HW * t_item
                       + N * num_j * 2 * chunk * 4,
    )

    partial = pl.pallas_call(
        kernel,
        out_shape=jax.ShapeDtypeStruct((N, num_j, 2, chunk), jnp.float32),
        grid=(N, num_j),
        in_specs=[
            pl.BlockSpec((1, C, t_hw), lambda n, j: (n, 0, j)),
            pl.BlockSpec((1, 1, t_hw), lambda n, j: (n, 0, j)),
        ],
        out_specs=pl.BlockSpec((1, 1, 2, chunk), lambda n, j: (n, j, 0, 0)),
        compiler_params=pltpu.CompilerParams(
            dimension_semantics=("parallel", "parallel"),
            vmem_limit_bytes=48 * 1024 * 1024,   # headroom under v7x's 64 MiB
        ),
        cost_estimate=cost,
    )(x, t)

    psum = jnp.sum(partial[:, :, 0, :])
    pcnt = jnp.sum(partial[:, :, 1, :])
    return psum / pcnt


def _reference_loss(output, target, ignore_index: int = -100):
    # Pure-JAX reference mirroring the PyTorch module semantics.
    N, C, H, W = output.shape
    x = jnp.transpose(output, (0, 2, 3, 1)).reshape(-1, C).astype(jnp.float32)
    t = target.reshape(-1).astype(jnp.int32)
    valid = t != ignore_index
    t_safe = jnp.where(valid, t, 0)
    lse = jax.scipy.special.logsumexp(x, axis=-1)
    ce = lse - x[jnp.arange(x.shape[0]), t_safe]
    pred = jnp.argmax(x, axis=-1).astype(jnp.int32)
    w = (jnp.abs(pred - t) + 1).astype(jnp.float32)
    num = jnp.sum(jnp.where(valid, ce * w, 0.0))
    den = jnp.sum(valid.astype(jnp.float32))
    return num / den


if __name__ == "__main__":
    key = jax.random.PRNGKey(0)
    k_out, k_tgt, k_msk, k_out2, k_tgt2, k_msk2 = jax.random.split(key, 6)

    ignore_index = -100

    # Case 1: shapes implied by the module spec (N=2, C=4, H=W=16), HW % 128 == 0.
    N, C, H, W = 2, 4, 16, 16
    output = jax.random.normal(k_out, (N, C, H, W), dtype=jnp.float32)
    target = jax.random.randint(k_tgt, (N, H, W), 0, C, dtype=jnp.int32)
    drop = jax.random.uniform(k_msk, (N, H, W)) < 0.1     # ~10% ignored positions
    target = jnp.where(drop, jnp.int32(ignore_index), target)

    loss = jax.block_until_ready(ordered_cross_entropy_loss(output, target, ignore_index))
    ref = jax.block_until_ready(_reference_loss(output, target, ignore_index))
    assert jnp.allclose(loss, ref, rtol=1e-5, atol=1e-5), (loss, ref)

    # Case 2: ragged spatial extent (HW=192, auto-tiled at 128) to exercise the
    # partial-tile masking path.
    N2, C2, H2, W2 = 2, 4, 16, 12
    output2 = jax.random.normal(k_out2, (N2, C2, H2, W2), dtype=jnp.float32)
    target2 = jax.random.randint(k_tgt2, (N2, H2, W2), 0, C2, dtype=jnp.int32)
    drop2 = jax.random.uniform(k_msk2, (N2, H2, W2)) < 0.1
    target2 = jnp.where(drop2, jnp.int32(ignore_index), target2)

    loss2 = jax.block_until_ready(
        ordered_cross_entropy_loss(output2, target2, ignore_index))
    ref2 = jax.block_until_ready(_reference_loss(output2, target2, ignore_index))
    assert jnp.allclose(loss2, ref2, rtol=1e-5, atol=1e-5), (loss2, ref2)

    print("KERNEL_OK")
</pallas_src>

<mosaic_0001>
module attributes {stable_mosaic.version = 11 : i64} {
  func.func @occ_loss_kernel(%arg0: i32, %arg1: i32, %arg2: memref<1x4x128xf32, #tpu.memory_space<vmem>>, %arg3: memref<1x1x128xi32, #tpu.memory_space<vmem>>, %arg4: memref<1x1x2x128xf32, #tpu.memory_space<vmem>>) attributes {dimension_semantics = [#tpu.dimension_semantics<parallel>, #tpu.dimension_semantics<parallel>], iteration_bounds = array<i64: 2, 2>, scalar_prefetch = 0 : i64, scratch_operands = 0 : i64, tpu.core_type = #tpu.core_type<tc>, window_params = [{transform_indices = @transform_0, window_bounds = array<i64: 1, 4, 128>}, {transform_indices = @transform_1, window_bounds = array<i64: 1, 1, 128>}, {transform_indices = @transform_2, window_bounds = array<i64: 1, 1, 2, 128>}]} {
    %0 = tpu.iota {dimensions = array<i32: 0>} : vector<4x128xi32>
    %cst = arith.constant 0.000000e+00 : f32
    %1 = vector.broadcast %cst : f32 to vector<1x128xf32>
    %c0_i32 = arith.constant 0 : i32
    %c128_i32 = arith.constant 128 : i32
    %2 = arith.muli %c0_i32, %c128_i32 : i32
    %3 = tpu.assume_multiple %2, 128 : i32
    %c0 = arith.constant 0 : index
    %c0_0 = arith.constant 0 : index
    %4 = arith.index_cast %3 : i32 to index
    %5 = vector.load %arg2[%c0, %c0_0, %4] : memref<1x4x128xf32, #tpu.memory_space<vmem>>, vector<1x4x128xf32>
    %6 = vector.shape_cast %5 : vector<1x4x128xf32> to vector<4x128xf32>
    %c0_1 = arith.constant 0 : index
    %c0_2 = arith.constant 0 : index
    %7 = arith.index_cast %3 : i32 to index
    %8 = vector.load %arg3[%c0_1, %c0_2, %7] : memref<1x1x128xi32, #tpu.memory_space<vmem>>, vector<1x1x128xi32>
    %9 = vector.shape_cast %8 : vector<1x1x128xi32> to vector<1x128xi32>
    %cst_3 = arith.constant dense<0xFF800000> : vector<128xf32>
    %10 = vector.multi_reduction <maximumf>, %6, %cst_3 [0] : vector<4x128xf32> to vector<128xf32>
    %11 = vector.shape_cast %10 : vector<128xf32> to vector<1x128xf32>
    %12 = vector.broadcast %11 : vector<1x128xf32> to vector<4x128xf32>
    %13 = arith.subf %6, %12 : vector<4x128xf32>
    %14 = math.exp %13 : vector<4x128xf32>
    %cst_4 = arith.constant dense<0.000000e+00> : vector<128xf32>
    %15 = vector.multi_reduction <add>, %14, %cst_4 [0] : vector<4x128xf32> to vector<128xf32>
    %16 = vector.shape_cast %15 : vector<128xf32> to vector<1x128xf32>
    %17 = math.log %16 : vector<1x128xf32>
    %18 = arith.addf %17, %11 : vector<1x128xf32>
    %19 = vector.broadcast %9 : vector<1x128xi32> to vector<4x128xi32>
    %20 = arith.cmpi eq, %0, %19 : vector<4x128xi32>
    %cst_5 = arith.constant 0.000000e+00 : f32
    %21 = vector.broadcast %cst_5 : f32 to vector<4x128xf32>
    %22 = arith.select %20, %6, %21 : vector<4x128xi1>, vector<4x128xf32>
    %cst_6 = arith.constant dense<0.000000e+00> : vector<128xf32>
    %23 = vector.multi_reduction <add>, %22, %cst_6 [0] : vector<4x128xf32> to vector<128xf32>
    %24 = vector.shape_cast %23 : vector<128xf32> to vector<1x128xf32>
    %25 = arith.subf %18, %24 : vector<1x128xf32>
    %26 = vector.broadcast %11 : vector<1x128xf32> to vector<4x128xf32>
    %27 = arith.cmpf oeq, %6, %26 : vector<4x128xf32>
    %c4_i32 = arith.constant 4 : i32
    %28 = vector.broadcast %c4_i32 : i32 to vector<4x128xi32>
    %29 = arith.select %27, %0, %28 : vector<4x128xi1>, vector<4x128xi32>
    %cst_7 = arith.constant dense<2147483647> : vector<128xi32>
    %30 = vector.multi_reduction <minsi>, %29, %cst_7 [0] : vector<4x128xi32> to vector<128xi32>
    %31 = vector.shape_cast %30 : vector<128xi32> to vector<1x128xi32>
    %32 = arith.subi %31, %9 : vector<1x128xi32>
    %33 = math.absi %32 : vector<1x128xi32>
    %c1_i32 = arith.constant 1 : i32
    %34 = vector.broadcast %c1_i32 : i32 to vector<1x128xi32>
    %35 = arith.addi %33, %34 : vector<1x128xi32>
    %36 = arith.sitofp %35 : vector<1x128xi32> to vector<1x128xf32>
    %c-100_i32 = arith.constant -100 : i32
    %37 = vector.broadcast %c-100_i32 : i32 to vector<1x128xi32>
    %38 = arith.cmpi ne, %9, %37 : vector<1x128xi32>
    %39 = arith.mulf %25, %36 : vector<1x128xf32>
    %cst_8 = arith.constant 0.000000e+00 : f32
    %40 = vector.broadcast %cst_8 : f32 to vector<1x128xf32>
    %41 = arith.select %38, %39, %40 : vector<1x128xi1>, vector<1x128xf32>
    %42 = arith.addf %1, %41 : vector<1x128xf32>
    %43 = arith.extui %38 : vector<1x128xi1> to vector<1x128xi32>
    %44 = arith.sitofp %43 : vector<1x128xi32> to vector<1x128xf32>
    %45 = arith.addf %1, %44 : vector<1x128xf32>
    %c1_i32_9 = arith.constant 1 : i32
    %c0_10 = arith.constant 0 : index
    %c0_11 = arith.constant 0 : index
    %c0_12 = arith.constant 0 : index
    %c0_13 = arith.constant 0 : index
    %46 = vector.load %arg4[%c0_10, %c0_11, %c0_12, %c0_13] : memref<1x1x2x128xf32, #tpu.memory_space<vmem>>, vector<1x1x1x128xf32>
    %47 = vector.shape_cast %46 : vector<1x1x1x128xf32> to vector<1x128xf32>
    %48 = vector.shape_cast %42 : vector<1x128xf32> to vector<1x1x1x128xf32>
    tpu.vector_store %arg4[%c0_10, %c0_11, %c0_12, %c0_13], %48 {strides = array<i32>} : memref<1x1x2x128xf32, #tpu.memory_space<vmem>>, vector<1x1x1x128xf32>,
    %c0_14 = arith.constant 0 : index
    %c0_15 = arith.constant 0 : index
    %c1 = arith.constant 1 : index
    %c0_16 = arith.constant 0 : index
    %49 = vector.load %arg4[%c0_14, %c0_15, %c1, %c0_16] : memref<1x1x2x128xf32, #tpu.memory_space<vmem>>, vector<1x1x1x128xf32>
    %50 = vector.shape_cast %49 : vector<1x1x1x128xf32> to vector<1x128xf32>
    %51 = vector.shape_cast %45 : vector<1x128xf32> to vector<1x1x1x128xf32>
    tpu.vector_store %arg4[%c0_14, %c0_15, %c1, %c0_16], %51 {strides = array<i32>} : memref<1x1x2x128xf32, #tpu.memory_space<vmem>>, vector<1x1x1x128xf32>,
    return
  }
  func.func @transform_0(%arg0: i32, %arg1: i32) -> (i32, i32, i32) {
    %c0_i32 = arith.constant 0 : i32
    %c0_i32_0 = arith.constant 0 : i32
    return %arg0, %c0_i32, %arg1 : i32, i32, i32
  }
  func.func @transform_1(%arg0: i32, %arg1: i32) -> (i32, i32, i32) {
    %c0_i32 = arith.constant 0 : i32
    %c0_i32_0 = arith.constant 0 : i32
    return %arg0, %c0_i32, %arg1 : i32, i32, i32
  }
  func.func @transform_2(%arg0: i32, %arg1: i32) -> (i32, i32, i32, i32) {
    %c0_i32 = arith.constant 0 : i32
    %c0_i32_0 = arith.constant 0 : i32
    %c0_i32_1 = arith.constant 0 : i32
    return %arg0, %arg1, %c0_i32, %c0_i32_0 : i32, i32, i32, i32
  }
}

</mosaic_0001>

<bundles_post_ra>
// kernel: tpu_custom_call.1
= control target key start
LH: loop header
LB: loop body
LE: loop exit
PB: predicated region body
PF: predicated region fallthrough
CT: control target
= control target key end

     0   :  { %7 = vsyncpa [#allocation3], 0  ;;  %s862_s0 = inlined_call_operand.hbm [shape: f32[2,4,256], index: 0, kind: input, shape index: {}]   ;;  %s863_s1 = inlined_call_operand.hbm [shape: s32[2,1,256], index: 1, kind: input, shape index: {}]   ;;  %s864_s2 = inlined_call_operand.hbm [shape: f32[2,2,2,128], index: 2, kind: output, shape index: {}]  }
   0x1   :  { %9 = vsyncpa [#allocation3 + $0x1], 0 }
   0x2   :  { %10 = vsyncpa [#allocation6], 0 }
   0x3   :  { %12 = vsyncpa [#allocation6 + $0x1], 0 }
   0x4   :  { %13 = vsyncpa [#allocation4], 0 }
   0x5   :  { %15 = vsyncpa [#allocation4 + $0x1], 0  ;;  %s691_s9 = smov 0   ;;  %s693_s10 = smov 0  }
   0x6   :  { %s695_s11 = smov 0   ;;  %s697_s12 = smov 0  }
   0x7   :  { %s699_s13 = smov 0   ;;  %s701_s14 = smov 0  }
   0x8   :  { %s703_s15 = smov 0   ;;  %s705_s16 = smov 0  }
   0x9 LB: > { %s405_s17 = sadd.s32 4294967295, %s673_s16   ;;  %s406_s18 = sadd.s32 4294967294, %s673_s16   ;;  %s673_s16 = sphi %s705_s16, %s21_s16   ;;  %s669_s15 = sphi %s703_s15, %s876_s15   ;;  %s665_s14 = sphi %s701_s14, %s875_s14   ;;  %s661_s13 = sphi %s699_s13, %s874_s13   ;;  %s657_s12 = sphi %s697_s12, %s873_s12   ;;  %s653_s11 = sphi %s695_s11, %s872_s11   ;;  %s649_s10 = sphi %s693_s10, %s871_s10   ;;  %s645_s9 = sphi %s691_s9, %s870_s9  }
   0xa   : > { %s30_s19 = sadd.s32 1, %s665_s14  ;;  %s33_s20 = sadd.s32 1, %s669_s15 }
   0xb   : > { %p31_p0 = scmp.ge.s32.totalorder %s30_s19, 2  ;;  %s42_s21 = sadd.s32 1, %s653_s11 }
   0xc   : > { %p49_p1 = scmp.ne.s32.totalorder %s653_s11, %s649_s10  ;;  %p50_p2 = scmp.eq.s32.totalorder %s673_s16, 0 }
   0xd   : > { %s878_s19 = smov (%p31_p0, %s30_s19), 0  ;;  %s880_s20 = smov (!%p31_p0, %s33_s20), %s669_s15 }
   0xe   : > { %s38_s22 = ssub.s32 %s665_s14, %s878_s19  ;;  %p744_p3 = por %p50_p2, %p49_p1 }
   0xf   : > { %p35_p4 = scmp.ge.s32.totalorder %s880_s20, 2  ;;  %p55_p5 = scmp.ne.s32.totalorder %s649_s10, %s645_s9 }
  0x10   : > { %p56_p6 = scmp.eq.s32.totalorder %s405_s17, 0  ;;  %p109_p7 = scmp.eq.s32.totalorder %s405_s17, 3 }
  0x11   : > { %s882_s20 = smov (%p35_p4, %s880_s20), 0  ;;  %p115_p10 = scmp.eq.s32.totalorder %s406_s18, 3 }
  0x12   : > { %p752_p8 = por %p56_p6, %p55_p5  ;;  %p756_p9 = por %p109_p7, %p49_p1 }
  0x13   : > { %s37_s26 = ssub.s32 %s669_s15, %s882_s20  ;;  %p762_p12 = por %p115_p10, %p55_p5 }
  0x14   : > { %s39_s27 = sor.u32 %s38_s22, %s37_s26  ;;  %p439_p13 = scmp.lt.s32.totalorder %s673_s16, 4 }
  0x15   : > { %p40_p11 = scmp.eq.s32.totalorder %s39_s27, 0  ;;  %s135_s29 = sand.u32 1, %s653_s11  }
  0x16   : > { %s409_s3 = sshll.u32 %s135_s29, 2  ;;  %s410_s4 = sshll.u32 %s669_s15, 1 }
  0x17   : > { %s769_s30 = scalar_select %p40_p11, %s653_s11, %s42_s21  }
  0x18   : > { %s143_s5 = sadd.s32 %s665_s14, %s410_s4  ;;  %s139_s6 = scalar_lea.vmem [#allocation2], %s409_s3 }
  0x19   : > { %s149_s7 = sshll.u32 %s139_s6, 4  ;;  %s411_s8 = sshll.u32 %s143_s5, 2  ;;  %s150_s7 = int_to_ptr.vmem [resolvable:$true] %s149_s7 }
  0x1a   : > { %s145_s22 = scalar_lea.hbm %s862_s0, %s411_s8  ;;  %p778_p0 = pnand %p439_p13, %p744_p3 }
  0x1b   : > { %s147_s21 = sshll.u32 %s145_s22, 4  ;;  %p413_p1 = scmp.ge.s32.totalorder %s673_s16, 1  ;;  %s148_s21 = int_to_ptr.hbm [resolvable:$true] %s147_s21 }
  0x1c   : > { %s136_s27 = scalar_lea.sflag [#allocation3], %s135_s29  ;;  %p173_p2 = scmp.lt.s32.totalorder %s673_s16, 5 }
  0x1d   : > { %431 = dma.hbm_to_vmem [thread:$0]  (!%p778_p0), %s148_s21, 64, %s150_s7, %s136_s27  }
  0x1e   : > { %s164_s6 = scalar_lea.hbm %s863_s1, %s143_s5  ;;  %p174_p4 = pnand %p413_p1, %p173_p2 }
  0x1f   : > { %s166_s8 = sshll.u32 %s164_s6, 4  ;;  %s159_s23 = scalar_lea.vmem [#allocation5], %s135_s29  ;;  %s167_s8 = int_to_ptr.hbm [resolvable:$true] %s166_s8 }
  0x20   : > { %s168_s17 = sshll.u32 %s159_s23, 4  ;;  %s157_s18 = scalar_lea.sflag [#allocation6], %s135_s29  ;;  %s169_s17 = int_to_ptr.vmem [resolvable:$true] %s168_s17 }
  0x21   : > { %434 = dma.hbm_to_vmem [thread:$0]  (!%p778_p0), %s167_s8, 16, %s169_s17, %s157_s18  }
  0x22   : > { %177 = sbr.rel (%p174_p4) target bundleno = 99 (0x63), region = 28  ;;  %s792_s22 = sand.u32 (!%p174_p4), 1, %s649_s10  }
  0x23   : > { %s414_s7 = sshll.u32 (!%p174_p4), %s792_s22, 2  ;;  %s180_s21 = scalar_lea.sflag (!%p174_p4), [#allocation3], %s792_s22 }
  0x24   : > { %s183_s27 = scalar_lea.vmem (!%p174_p4), [#allocation2], %s414_s7 }
  0x27   : > { %632 = dma.done.wait (%p752_p8), %s180_s21, 64  }
  0x28   : > { %634 = vsyncadd (%p752_p8), %s180_s21, 4294967232  ;;  %s190_s29 = scalar_lea.sflag [#allocation6], %s792_s22  ;;  %s192_s5 = scalar_lea.vmem [#allocation5], %s792_s22 }
  0x29   : > { %636 = dma.done.wait (%p752_p8), %s190_s29, 16  }
  0x2a   : > { %638 = vsyncadd (%p752_p8), %s190_s29, 4294967280  ;;  %vm222_vm0 = vcmask 1043456   ;;  %v220_v0 = vld [vmem:[%s183_s27] sm:$0xf]  ;;  %v218_v5 = vlaneseq  ;;  %s415_s26 = sshll.u32 %s792_s22, 1  ;;  %v675_v20 = vmov 0.0  }
  0x2b   : > { %v223_v1 = vsel %vm222_vm0, %v220_v0, -inf  ;;  %v506_v10 = vld [vmem:[%s192_s5] ss:$0 sm:$0xff]  ;;  %s811_s24 = scalar_lea.vmem [#allocation7], %s415_s26  ;;  %s418_s3 = sshll.u32 %s661_s13, 1 }
  0x2c   : > { %v224_v2 = vrot.slane %v223_v1, 4  ;;  %v219_v8 = vshrl.u32 %v218_v5, 7  ;;  %v221_v15 = vld [vmem:[%s192_s5] sm:$0x1]  ;;  %s292_s4 = sadd.s32 %s657_s12, %s418_s3  ;;  %s296_s13 = sshll.u32 %s811_s24, 4  ;;  %s297_s13 = int_to_ptr.vmem [resolvable:$true] %s296_s13 }
  0x2d   : > { %vm272_vm3 = vcmp.ne.s32.totalorder %v221_v15, 4294967196  ;;  %s419_s6 = sshll.u32 %s292_s4, 1  ;;  %s282_s12 = scalar_lea.sflag [#allocation4], %s792_s22 }
  0x2e   : > { %v225_v3 = vmax.f32 %v223_v1, %v224_v2  ;;  %vm244_vm2 = vcmp.eq.s32.totalorder %v219_v8, %v506_v10  ;;  %v416_v21 = vsel %vm272_vm3, 1.0, %v675_v20  ;;  %s294_s17 = scalar_lea.hbm %s864_s2, %s419_s6  ;;  %s591_s5 = scalar_lea.hbm %s864_s2, 8 }
  0x2f   : > { %v245_v17 = vsel %vm244_vm2, %v220_v0, 0.0  ;;  %280 = vst [vmem:[%s811_s24 + $0x1] sm:$0x1] %v416_v21  ;;  %s298_s18 = sshll.u32 %s294_s17, 4  ;;  %s299_s18 = int_to_ptr.hbm [resolvable:$true] %s298_s18 }
  0x30   : > { %v226_v4 = vrot.slane %v225_v3, 2  ;;  %v246_v22 = vsel %vm222_vm0, %v245_v17, 0.0  ;;  %s585_s7 = sshra.s32 %s299_s18, 4  ;;  %s586_s7 = int_to_ptr.hbm [resolvable:$true] %s585_s7 }
  0x31   : > { %v247_v26 = vrot.slane %v246_v22, 4  ;;  %s587_s21 = scalar_lea.hbm %s586_s7, 2  ;;  %p592_p7 = scmp.lt.s32.totalorder %s586_s7, %s864_s2 }
  0x32   : > { %v227_v6 = vmax.f32 %v225_v3, %v226_v4  ;;  %p588_p3 = scmp.ne.s32.totalorder %s586_s7, %s587_s21  ;;  %p593_p8 = scmp.lt.s32.totalorder %s591_s5, %s587_s21 }
  0x33   : > { %v248_v30 = vadd.f32 %v247_v26, %v246_v22 }
  0x34   : > { %v228_v7 = vrot.slane %v227_v6, 1  ;;  %p589_p5 = pnand %p588_p3, %p756_p9  ;;  %p594_p10 = por %p593_p8, %p592_p7 }
  0x35   : > { %v249_v35 = vrot.slane %v248_v30, 2 }
  0x36   : > { %v229_v9 = vmax.f32 %v227_v6, %v228_v7  ;;  %p590_p6 = pneg %p589_p5 }
  0x37   : > { %v250_v39 = vadd.f32 %v249_v35, %v248_v30 }
  0x38   : > { %v230_v11 = vsub.f32 %v220_v0, %v229_v9  ;;  %vm254_vm1 = vcmp.eq.f32.partialorder %v220_v0, %v229_v9  ;;  %p595_p11 = pnand %p594_p10, %p590_p6 }
  0x39   : > { %v255_v12 = vsel %vm254_vm1, %v219_v8, 4  ;;  %v251_v41 = vrot.slane %v250_v39, 1 }
  0x3a   : > { %v231_v13 = vmul.f32 1.442695, %v230_v11  ;;  %v256_v14 = vsel %vm222_vm0, %v255_v12, 2147483647 }
  0x3b   : > { %v257_v16 = vrot.slane %v256_v14, 4  ;;  %v252_v45 = vadd.f32 %v251_v41, %v250_v39 }
  0x3c   : > { %507 = vpow2.f32 %v231_v13 }
  0x3d   : > { %vm258_vm4 = vcmp.lt.s32.totalorder %v256_v14, %v257_v16 }
  0x3e   : > { %v259_v18 = vsel %vm258_vm4, %v256_v14, %v257_v16 }
  0x3f   : > { %v260_v19 = vrot.slane %v259_v18, 2 }
  0x41   : > { %vm261_vm5 = vcmp.lt.s32.totalorder %v259_v18, %v260_v19 }
  0x42   : > { %v508_v23 = vpop.eup %507  ;;  %v262_v24 = vsel %vm261_vm5, %v259_v18, %v260_v19 }
  0x43   : > { %v233_v25 = vsel %vm222_vm0, %v508_v23, 0.0  ;;  %v263_v27 = vrot.slane %v262_v24, 1 }
  0x44   : > { %v234_v28 = vrot.slane %v233_v25, 4 }
  0x45   : > { %vm264_vm6 = vcmp.lt.s32.totalorder %v262_v24, %v263_v27 }
  0x46   : > { %v235_v29 = vadd.f32 %v234_v28, %v233_v25  ;;  %v265_v31 = vsel %vm264_vm6, %v262_v24, %v263_v27 }
  0x47   : > { %v266_v34 = vsub.s32 %v265_v31, %v221_v15 }
  0x48   : > { %v236_v32 = vrot.slane %v235_v29, 2 }
  0x49   : > { %v268_v38 = vsub.s32 0, %v266_v34  ;;  %vm267_vm7 = vcmp.lt.s32.totalorder %v266_v34, 0 }
  0x4a   : > { %v237_v33 = vadd.f32 %v236_v32, %v235_v29 }
  0x4b   : > { %v269_v40 = vsel %vm267_vm7, %v268_v38, %v266_v34 }
  0x4c   : > { %v238_v36 = vrot.slane %v237_v33, 1  ;;  %v270_v42 = vadd.s32 1, %v269_v40 }
  0x4e   : > { %v239_v37 = vadd.f32 %v238_v36, %v237_v33  ;;  %v271_v47 = vcvt.s32.f32 %v270_v42 }
  0x50   : > { %509 = vlog2.f32 %v239_v37 }
  0x56   : > { %v510_v43 = vpop.eup %509 }
  0x57   : > { %v241_v44 = vmul.f32 0.6931472, %v510_v43 }
  0x59   : > { %v242_v46 = vadd.f32 %v241_v44, %v229_v9 }
  0x5b   : > { %v253_v48 = vsub.f32 %v242_v46, %v252_v45 }
  0x5d   : > { %v273_v49 = vmul.f32 %v271_v47, %v253_v48 }
  0x5f   : > { %v274_v50 = vsel %vm272_vm3, %v273_v49, 0.0 }
  0x60   : > { %279 = vst [vmem:[%s811_s24] sm:$0x1] %v274_v50 }
  0x61   : > { %598 = shalt.err (!%p595_p11)
}
  0x62   : > { %426 = dma.vmem_to_hbm [thread:$0]  (%p756_p9), %s297_s13, 32, %s299_s18, %s282_s12  }
  0x63 PF: > { %p440_p13 = scmp.ge.s32.totalorder %s673_s16, 2  ;;  %s310_s22 = sand.u32 1, %s645_s9  }
  0x64   : > { %s311_s24 = scalar_lea.sflag [#allocation4], %s310_s22 }
  0x65   : > { %p436_p0 = pnand %p440_p13, %p762_p12 }
  0x67   : > { %p437_p1 = pneg %p436_p0 }
  0x69   : > { %640 = dma.done.wait (%p437_p1), %s311_s24, 32  }
  0x6a   : > { %642 = vsyncadd (%p437_p1), %s311_s24, 4294967264  ;;  %s21_s16 = sadd.s32 1, %s673_s16   ;;  %s870_s9 = smov %s649_s10 }
  0x6b   : > { %p18_p2 = scmp.ge.s32.totalorder %s21_s16, 6   ;;  %s871_s10 = smov %s653_s11 }
  0x6c   : > { %s872_s11 = smov %s769_s30  ;;  %s873_s12 = smov %s665_s14 }
  0x6d   : > { %s874_s13 = smov %s669_s15  ;;  %s875_s14 = smov %s878_s19 }
  0x6e   : > { %s876_s15 = smov %s882_s20  ;;  %20 = sbr.rel (!%p18_p2) target bundleno = 9 (0x9), region = 86 }
  0x73   :  { %317 = vsyncpa [#allocation3], 1 }
  0x74   :  { %319 = vsyncpa [#allocation3 + $0x1], 1 }
  0x75   :  { %320 = vsyncpa [#allocation6], 1 }
  0x76   :  { %322 = vsyncpa [#allocation6 + $0x1], 1 }
  0x77   :  { %323 = vsyncpa [#allocation4], 1 }
  0x78   :  { %325 = vsyncpa [#allocation4 + $0x1], 1 }

</bundles_post_ra>
